<compile_context>
chip_gen: v6e
topology: v6e:2x2x1
jax: 0.10.0
libtpu: 0.0.40
codegen_flags: <defaults>
</compile_context>

<pallas_src>
import functools
import math
from collections import OrderedDict
from functools import partial

import jax
import jax.numpy as jnp
from jax.experimental import pallas as pl
from jax.experimental.pallas import tpu as pltpu


def _round_up(x, m):
    return ((x + m - 1) // m) * m


# ---------------------------------------------------------------------------
# Chip-derived budgets.
# ---------------------------------------------------------------------------
@functools.lru_cache(maxsize=None)
def _vmem_capacity_bytes():
    try:
        info = pltpu.get_tpu_info()
        cap = int(getattr(info, "vmem_capacity_bytes", 0))
        if cap > 0:
            return cap
    except Exception:
        pass
    return 64 * 1024 * 1024            # conservative (v7x-sized) fallback


def _vmem_limit_bytes():
    return min(_vmem_capacity_bytes() * 3 // 4, 100 * 1024 * 1024)


def _band_bytes():                     # conv3x3 row-band budget (per input block)
    return (2 << 20) if _vmem_capacity_bytes() <= (64 << 20) else (6 << 20)


def _xblock_bytes():                   # matmul / lateral row-block budget
    return (4 << 20) if _vmem_capacity_bytes() <= (64 << 20) else (8 << 20)


def _tm_cap():
    return 512 if _vmem_capacity_bytes() <= (64 << 20) else 2048


# ---------------------------------------------------------------------------
# Kernel 1: tiled (rows @ W + bias [+ residual]) with optional fused input ReLU.
# ---------------------------------------------------------------------------
def _matmul_bias_kernel(x_ref, w_ref, b_ref, o_ref, *, relu_input):
    x = x_ref[...]
    if relu_input:
        x = jnp.maximum(x, 0)
    acc = jnp.dot(x, w_ref[...], preferred_element_type=jnp.float32)
    acc = acc + b_ref[...].astype(jnp.float32)
    o_ref[...] = acc.astype(o_ref.dtype)


def _matmul_bias_add_kernel(x_ref, w_ref, b_ref, add_ref, o_ref, *, relu_input):
    x = x_ref[...]
    if relu_input:
        x = jnp.maximum(x, 0)
    acc = jnp.dot(x, w_ref[...], preferred_element_type=jnp.float32)
    acc = acc + b_ref[...].astype(jnp.float32) + add_ref[...].astype(jnp.float32)
    o_ref[...] = acc.astype(o_ref.dtype)


def _pallas_matmul_bias(x2d, w, b2d, add2d=None, relu_input=False):
    M, K = x2d.shape
    Cout = w.shape[1]
    itemsize = x2d.dtype.itemsize
    tm = max(8, (_xblock_bytes() // max(1, K * itemsize)) // 8 * 8)
    tm = min(tm, _tm_cap(), _round_up(M, 8))
    if M > 16:                                   # >=2 row blocks keeps both v7x TCs busy
        tm = min(tm, _round_up((M + 1) // 2, 8))
    while tm > 8 and M % tm:                     # prefer a divisor of M: no pad/slice pass
        tm -= 8
    Mp = _round_up(M, tm)
    if Mp != M:                                  # only for ragged / tiny M
        x2d = jnp.pad(x2d, ((0, Mp - M), (0, 0)))
        if add2d is not None:
            add2d = jnp.pad(add2d, ((0, Mp - M), (0, 0)))

    in_specs = [
        pl.BlockSpec((tm, K), lambda i: (i, 0)),        # x rows: tiled
        pl.BlockSpec((K, Cout), lambda i: (0, 0)),      # weight: VMEM-resident
        pl.BlockSpec((1, Cout), lambda i: (0, 0)),      # bias:   VMEM-resident
    ]
    args = [x2d, w, b2d]
    if add2d is None:
        kernel = partial(_matmul_bias_kernel, relu_input=relu_input)
    else:
        in_specs.append(pl.BlockSpec((tm, Cout), lambda i: (i, 0)))
        args.append(add2d)
        kernel = partial(_matmul_bias_add_kernel, relu_input=relu_input)

    out = pl.pallas_call(
        kernel,
        grid=(Mp // tm,),
        in_specs=in_specs,
        out_specs=pl.BlockSpec((tm, Cout), lambda i: (i, 0)),
        out_shape=jax.ShapeDtypeStruct((Mp, Cout), x2d.dtype),
        compiler_params=pltpu.CompilerParams(
            dimension_semantics=("parallel",),
            vmem_limit_bytes=_vmem_limit_bytes()),
    )(*args)
    return out[:M] if Mp != M else out


# ---------------------------------------------------------------------------
# Kernel 2: fused lateral 1x1 conv + nearest-2x upsample residual add.
#   up_ref carries th//2 coarse rows (already W-repeated at coarse resolution);
#   the H repeat is realised by broadcasting over pairs of fine rows.
# ---------------------------------------------------------------------------
def _lateral_add_kernel(x_ref, w_ref, b_ref, up_ref, o_ref):
    _, th, wout, cin = x_ref.shape
    cout = o_ref.shape[-1]
    acc = jnp.dot(x_ref[0].reshape(th * wout, cin), w_ref[...],
                  preferred_element_type=jnp.float32)
    acc = acc + b_ref[...].astype(jnp.float32)
    acc = acc.reshape(th // 2, 2, wout, cout)
    acc = acc + up_ref[0].astype(jnp.float32)[:, None, :, :]
    o_ref[0] = acc.reshape(th, wout, cout).astype(o_ref.dtype)


def _nearest_resize_nhwc(x, out_hw):
    # F.interpolate(mode='nearest'): src = floor(dst * in / out)
    N, H, W, C = x.shape
    Ho, Wo = out_hw
    if Ho % H == 0 and Wo % W == 0:                    # exact integer upscale
        x = jnp.repeat(x, Ho // H, axis=1)
        return jnp.repeat(x, Wo // W, axis=2)
    hi = (jnp.arange(Ho) * H // Ho).astype(jnp.int32)
    wi = (jnp.arange(Wo) * W // Wo).astype(jnp.int32)
    return x[:, hi][:, :, wi]


def _conv1x1_lateral_nhwc(x, w_oihw, b, coarse=None, compute_dtype=jnp.float32):
    """1x1 conv + bias; if `coarse` is given, fuses the nearest-upsample residual add."""
    x = x.astype(compute_dtype)
    N, H, W, Cin = x.shape
    Cout = w_oihw.shape[0]
    w2 = jnp.transpose(w_oihw, (2, 3, 1, 0)).reshape(Cin, Cout).astype(compute_dtype)
    b2 = b.reshape(1, Cout).astype(jnp.float32)

    if coarse is None:
        out2d = _pallas_matmul_bias(x.reshape(N * H * W, Cin), w2, b2)
        return out2d.reshape(N, H, W, Cout)

    coarse = coarse.astype(compute_dtype)
    Hc, Wc = coarse.shape[1], coarse.shape[2]
    if (H, W) != (2 * Hc, 2 * Wc):
        # Non-2x ratio: fall back to a materialised floor-index nearest upsample.
        up = _nearest_resize_nhwc(coarse, (H, W))
        out2d = _pallas_matmul_bias(x.reshape(N * H * W, Cin), w2, b2,
                                    add2d=up.reshape(N * H * W, Cout))
        return out2d.reshape(N, H, W, Cout)

    # Exact-2x: repeat W at *coarse* resolution (half-size temp); H repeat in-kernel.
    coarse_w = jnp.repeat(coarse, 2, axis=2)                    # (N, Hc, W, Cout)
    itemsize = jnp.dtype(compute_dtype).itemsize
    th = max(2, min(H, _xblock_bytes() // max(1, W * Cin * itemsize)) // 2 * 2)
    if N == 1 and H >= 4:                       # >=2 blocks so both v7x TCs get work
        th = min(th, max(2, (H // 2) // 2 * 2))
    while th > 2 and H % th:
        th -= 2

    return pl.pallas_call(
        _lateral_add_kernel,
        grid=(N, H // th),
        in_specs=[
            pl.BlockSpec((1, th, W, Cin), lambda n, i: (n, i, 0, 0)),
            pl.BlockSpec((Cin, Cout), lambda n, i: (0, 0)),          # resident
            pl.BlockSpec((1, Cout), lambda n, i: (0, 0)),            # resident
            pl.BlockSpec((1, th // 2, W, Cout), lambda n, i: (n, i, 0, 0)),
        ],
        out_specs=pl.BlockSpec((1, th, W, Cout), lambda n, i: (n, i, 0, 0)),
        out_shape=jax.ShapeDtypeStruct((N, H, W, Cout), compute_dtype),
        compiler_params=pltpu.CompilerParams(
            dimension_semantics=("parallel", "parallel"),
            vmem_limit_bytes=_vmem_limit_bytes()),
    )(x, w2, b2, coarse_w)


# ---------------------------------------------------------------------------
# Kernel 3: 3x3 / stride-1 / pad-1 conv.
#   Flat row band + 2-row halo, taps realised with pltpu.roll on the flattened
#   window (wrap-around only touches rows/columns that are sliced away).
# ---------------------------------------------------------------------------
def _conv3x3_kernel(xa_ref, xh_ref, w_ref, b_ref, o_ref, *, th, wp, wout):
    cout = o_ref.shape[-1]
    mw = (th + 2) * wp
    # Window = this band's th padded rows plus the 2-row halo just below it.
    win = jnp.concatenate([xa_ref[0], xh_ref[0]], axis=0)        # (mw, Cin)
    win32 = win.astype(jnp.float32)      # rolls on a 32-bit copy (bf16-safe)
    acc = jnp.zeros((mw, cout), jnp.float32)
    for dy in range(3):
        for dx in range(3):
            s = dy * wp + dx
            if s == 0:
                taps = win
            else:
                # taps[m] = win[m + s]; the mod-wrap only affects discarded outputs.
                taps = pltpu.roll(win32, mw - s, axis=0).astype(win.dtype)
            acc = acc + jnp.dot(taps, w_ref[dy, dx],
                                preferred_element_type=jnp.float32)
    acc = acc + b_ref[...].astype(jnp.float32)
    out = acc.reshape(th + 2, wp, cout)[:th, :wout, :]
    o_ref[0] = out.astype(o_ref.dtype)


def _conv3x3_same_nhwc(x, w_oihw, b, compute_dtype=jnp.float32):
    """3x3, stride 1, padding 1 convolution on an NHWC tensor."""
    x = x.astype(compute_dtype)
    N, H, W, C = x.shape
    Cout = w_oihw.shape[0]
    w = jnp.transpose(w_oihw, (2, 3, 1, 0)).astype(compute_dtype)   # (3,3,Cin,Cout)
    b2 = b.reshape(1, Cout).astype(jnp.float32)

    itemsize = jnp.dtype(compute_dtype).itemsize
    Wp = _round_up(W + 2, 8)                    # width padded to a sublane multiple
    row_bytes = Wp * C * itemsize
    th = max(2, min(_round_up(H, 2),
                    (_band_bytes() // max(1, row_bytes)) // 2 * 2))
    if N == 1 and H >= 4:                       # >=2 blocks for v7x megacore
        th = min(th, max(2, (H // 2) // 2 * 2))
    while th > 2 and H % th:                    # prefer a divisor of H: no output slice
        th -= 2
    Hp = _round_up(H, th)
    nb = Hp // th
    R = Hp + 2                                  # 1 top pad row + rows + bottom pad/halo
    # TODO(synk): write the previous level's output directly in this padded layout to
    #             drop the explicit border pad pass.
    xp = jnp.pad(x, ((0, 0), (1, R - H - 1), (1, Wp - W - 1), (0, 0)))
    xf = xp.reshape(N, R * Wp, C)               # contiguous merge: free reshape

    out = pl.pallas_call(
        partial(_conv3x3_kernel, th=th, wp=Wp, wout=W),
        grid=(N, nb),
        in_specs=[
            pl.BlockSpec((1, th * Wp, C), lambda n, i: (n, i, 0)),              # band
            pl.BlockSpec((1, 2 * Wp, C),
                         lambda n, i: (n, (i + 1) * th // 2, 0)),               # 2-row halo
            pl.BlockSpec((3, 3, C, Cout), lambda n, i: (0, 0, 0, 0)),           # resident
            pl.BlockSpec((1, Cout), lambda n, i: (0, 0)),                       # resident
        ],
        out_specs=pl.BlockSpec((1, th, W, Cout), lambda n, i: (n, i, 0, 0)),
        out_shape=jax.ShapeDtypeStruct((N, Hp, W, Cout), compute_dtype),
        compiler_params=pltpu.CompilerParams(
            dimension_semantics=("parallel", "parallel"),
            vmem_limit_bytes=_vmem_limit_bytes()),
    )(xf, xf, w, b2)
    return out if Hp == H else out[:, :H]


# ---------------------------------------------------------------------------
# Small strided 3x3 convs (P6 / P7) via im2col + kernel 1.
# ---------------------------------------------------------------------------
def _im2col(x, ksize, stride, pad):
    N, H, W, C = x.shape
    xp = jnp.pad(x, ((0, 0), (pad, pad), (pad, pad), (0, 0)))
    Ho = (H + 2 * pad - ksize) // stride + 1
    Wo = (W + 2 * pad - ksize) // stride + 1
    cols = []
    for dy in range(ksize):
        for dx in range(ksize):
            cols.append(xp[:, dy:dy + stride * Ho:stride,
                           dx:dx + stride * Wo:stride, :])
    patches = jnp.concatenate(cols, axis=-1)        # (N, Ho, Wo, k*k*C)
    return patches.reshape(N * Ho * Wo, ksize * ksize * C), (N, Ho, Wo)


def _conv2d_strided_nhwc(x, w_oihw, b, stride, pad, relu_input=False,
                         compute_dtype=jnp.float32):
    Cout, Cin, kh, kw = w_oihw.shape
    w_flat = jnp.transpose(w_oihw, (2, 3, 1, 0)).reshape(kh * kw * Cin, Cout)
    w_flat = w_flat.astype(compute_dtype)
    x = x.astype(compute_dtype)
    patches, (N, Ho, Wo) = _im2col(x, kh, stride, pad)
    out2d = _pallas_matmul_bias(patches, w_flat,
                                b.reshape(1, Cout).astype(jnp.float32),
                                relu_input=relu_input)
    return out2d.reshape(N, Ho, Wo, Cout)


# ---------------------------------------------------------------------------
# Parameter init: kaiming_uniform_(a=1) => bound = sqrt(3 / fan_in), bias = 0.
# ---------------------------------------------------------------------------
def _init_conv(key, cout, cin, k):
    bound = math.sqrt(3.0 / (cin * k * k))
    w = jax.random.uniform(key, (cout, cin, k, k), jnp.float32, -bound, bound)
    b = jnp.zeros((cout,), jnp.float32)
    return w, b


class FeaturePyramidNetworkPallas:
    def __init__(self, in_channels_list, out_channels=256,
                 pyramid_levels=(3, 4, 5, 6, 7), key=None,
                 compute_dtype=jnp.bfloat16):
        self.pyramid_levels = list(pyramid_levels)
        self.compute_dtype = compute_dtype
        if 2 in self.pyramid_levels:
            assert len(in_channels_list) == 4
        if len(in_channels_list) == 3:
            C3, C4, C5 = in_channels_list
            C2 = C3
        else:
            C2, C3, C4, C5 = in_channels_list
        key = jax.random.PRNGKey(0) if key is None else key
        ks = jax.random.split(key, 10)
        self.P5_1 = _init_conv(ks[0], out_channels, C5, 1)
        self.P5_2 = _init_conv(ks[1], out_channels, out_channels, 3)
        self.P4_1 = _init_conv(ks[2], out_channels, C4, 1)
        self.P4_2 = _init_conv(ks[3], out_channels, out_channels, 3)
        self.P3_1 = _init_conv(ks[4], out_channels, C3, 1)
        self.P3_2 = _init_conv(ks[5], out_channels, out_channels, 3)
        if 2 in self.pyramid_levels:
            self.P2_1 = _init_conv(ks[6], out_channels, C2, 1)
            self.P2_2 = _init_conv(ks[7], out_channels, out_channels, 3)
        if 6 in self.pyramid_levels:
            self.P6 = _init_conv(ks[8], out_channels, C5, 3)
        if 7 in self.pyramid_levels:
            self.P7_2 = _init_conv(ks[9], out_channels, out_channels, 3)

    def __call__(self, inputs_nchw):
        dt = self.compute_dtype
        # TODO(synk): fold the NCHW->NHWC transpose of the backbone features into the
        #             lateral matmul (read X as (Cin, H*W) blocks) to save an HBM pass.
        C2, C3, C4, C5 = [jnp.transpose(v, (0, 2, 3, 1)).astype(dt)
                          for v in inputs_nchw]

        P5_pre = _conv1x1_lateral_nhwc(C5, *self.P5_1, compute_dtype=dt)
        P5_out = _conv3x3_same_nhwc(P5_pre, *self.P5_2, compute_dtype=dt)

        P4_pre = _conv1x1_lateral_nhwc(C4, *self.P4_1, coarse=P5_pre,
                                       compute_dtype=dt)
        P4_out = _conv3x3_same_nhwc(P4_pre, *self.P4_2, compute_dtype=dt)

        P3_pre = _conv1x1_lateral_nhwc(C3, *self.P3_1, coarse=P4_pre,
                                       compute_dtype=dt)
        P3_out = _conv3x3_same_nhwc(P3_pre, *self.P3_2, compute_dtype=dt)

        outs, names = [P3_out, P4_out, P5_out], ['P3', 'P4', 'P5']
        if 2 in self.pyramid_levels:
            P2_pre = _conv1x1_lateral_nhwc(C2, *self.P2_1, coarse=P3_pre,
                                           compute_dtype=dt)
            P2_out = _conv3x3_same_nhwc(P2_pre, *self.P2_2, compute_dtype=dt)
            outs, names = [P2_out] + outs, ['P2'] + names
        if 6 in self.pyramid_levels:
            P6_out = _conv2d_strided_nhwc(C5, *self.P6, stride=2, pad=1,
                                          compute_dtype=dt)
            outs, names = outs + [P6_out], names + ['P6']
        if 7 in self.pyramid_levels:
            if 6 not in self.pyramid_levels:
                raise ValueError('P6 is required to use P7')
            # P7_1 ReLU fused into the P7_2 conv kernel (relu_input=True).
            P7_out = _conv2d_strided_nhwc(P6_out, *self.P7_2, stride=2, pad=1,
                                          relu_input=True, compute_dtype=dt)
            outs, names = outs + [P7_out], names + ['P7']

        return OrderedDict((n, jnp.transpose(v, (0, 3, 1, 2)))
                           for n, v in zip(names, outs))


# ---------------------------------------------------------------------------
# Pure-JAX reference (lax.conv, NCHW, f32) for correctness.
# ---------------------------------------------------------------------------
def _ref_conv_nchw(x, w, b, stride=1, pad=0):
    y = jax.lax.conv_general_dilated(
        x, w, (stride, stride), [(pad, pad), (pad, pad)],
        dimension_numbers=('NCHW', 'OIHW', 'NCHW'))
    return y + b[None, :, None, None]


def _ref_resize_nchw(x, out_hw):
    N, C, H, W = x.shape
    Ho, Wo = out_hw
    hi = (jnp.arange(Ho) * H // Ho).astype(jnp.int32)
    wi = (jnp.arange(Wo) * W // Wo).astype(jnp.int32)
    return x[:, :, hi][:, :, :, wi]


def _ref_fpn(fpn, inputs):
    C2, C3, C4, C5 = inputs
    P5 = _ref_conv_nchw(C5, *fpn.P5_1)
    P5u = _ref_resize_nchw(P5, C4.shape[-2:])
    P5 = _ref_conv_nchw(P5, *fpn.P5_2, stride=1, pad=1)
    P4 = _ref_conv_nchw(C4, *fpn.P4_1) + P5u
    P4u = _ref_resize_nchw(P4, C3.shape[-2:])
    P4 = _ref_conv_nchw(P4, *fpn.P4_2, stride=1, pad=1)
    P3 = _ref_conv_nchw(C3, *fpn.P3_1) + P4u
    P3 = _ref_conv_nchw(P3, *fpn.P3_2, stride=1, pad=1)
    P6 = _ref_conv_nchw(C5, *fpn.P6, stride=2, pad=1)
    P7 = _ref_conv_nchw(jnp.maximum(P6, 0.0), *fpn.P7_2, stride=2, pad=1)
    return OrderedDict([('P3', P3), ('P4', P4), ('P5', P5),
                        ('P6', P6), ('P7', P7)])


if __name__ == "__main__":
    key = jax.random.PRNGKey(0)
    k_in, k_par = jax.random.split(key)
    kc2, kc3, kc4, kc5 = jax.random.split(k_in, 4)

    # Small synthetic backbone features (NCHW, PyTorch convention).
    batch = 2
    in_channels_list = [8, 16, 32]            # (C3, C4, C5) channels
    out_channels = 128                        # lane-dense outputs
    C2 = jax.random.normal(kc2, (batch, 8, 32, 32), jnp.float32)   # unused (no P2)
    C3 = jax.random.normal(kc3, (batch, 8, 16, 16), jnp.float32)
    C4 = jax.random.normal(kc4, (batch, 16, 8, 8), jnp.float32)
    C5 = jax.random.normal(kc5, (batch, 32, 4, 4), jnp.float32)
    inputs = [C2, C3, C4, C5]

    names = ['P3', 'P4', 'P5', 'P6', 'P7']

    # f32 path: strict check against the lax.conv reference.
    fpn = FeaturePyramidNetworkPallas(in_channels_list, out_channels,
                                      pyramid_levels=[3, 4, 5, 6, 7], key=k_par,
                                      compute_dtype=jnp.float32)
    out = fpn(inputs)
    jax.block_until_ready(out)
    ref = _ref_fpn(fpn, inputs)
    for name in names:
        assert out[name].shape == ref[name].shape, (name, out[name].shape)
        err = float(jnp.max(jnp.abs(out[name] - ref[name])))
        assert err < 1e-3, f"{name} f32 mismatch, max abs err {err}"

    # bf16 (default) path: halved HBM traffic, f32 accumulation; loose check.
    fpn_bf16 = FeaturePyramidNetworkPallas(in_channels_list, out_channels,
                                           pyramid_levels=[3, 4, 5, 6, 7],
                                           key=k_par)
    out16 = fpn_bf16(inputs)
    jax.block_until_ready(out16)
    for name in names:
        assert out16[name].shape == ref[name].shape, (name, out16[name].shape)
        scale = float(jnp.max(jnp.abs(ref[name]))) + 1e-6
        err = float(jnp.max(jnp.abs(out16[name].astype(jnp.float32) - ref[name])))
        assert err / scale < 0.1, f"{name} bf16 mismatch, rel err {err / scale}"

    print("KERNEL_OK")
</pallas_src>

<mosaic_0001>
module attributes {stable_mosaic.version = 11 : i64} {
  func.func @_matmul_bias_kernel(%arg0: i32, %arg1: memref<16x32xf32, #tpu.memory_space<vmem>>, %arg2: memref<32x128xf32, #tpu.memory_space<vmem>>, %arg3: memref<1x128xf32, #tpu.memory_space<vmem>>, %arg4: memref<16x128xf32, #tpu.memory_space<vmem>>) attributes {dimension_semantics = [#tpu.dimension_semantics<parallel>], iteration_bounds = array<i64: 2>, scalar_prefetch = 0 : i64, scratch_operands = 0 : i64, tpu.core_type = #tpu.core_type<tc>, window_params = [{transform_indices = @transform_0, window_bounds = array<i64: 16, 32>}, {pipeline_mode = #tpu.pipeline_mode<synchronous>, transform_indices = @transform_1, window_bounds = array<i64: 32, 128>}, {pipeline_mode = #tpu.pipeline_mode<synchronous>, transform_indices = @transform_2, window_bounds = array<i64: 1, 128>}, {transform_indices = @transform_3, window_bounds = array<i64: 16, 128>}]} {
    %c0 = arith.constant 0 : index
    %c0_0 = arith.constant 0 : index
    %0 = vector.load %arg1[%c0, %c0_0] : memref<16x32xf32, #tpu.memory_space<vmem>>, vector<16x32xf32>
    %c0_1 = arith.constant 0 : index
    %c0_2 = arith.constant 0 : index
    %1 = vector.load %arg2[%c0_1, %c0_2] : memref<32x128xf32, #tpu.memory_space<vmem>>, vector<32x128xf32>
    %cst = arith.constant dense<0.000000e+00> : vector<16x128xf32>
    %2 = tpu.matmul %0, %1, %cst {dimension_numbers = #tpu.dot_dimension_numbers<[1], [0], [0], [1], [0, 0, 1, 1], [], []>} : vector<16x32xf32>, vector<32x128xf32>, vector<16x128xf32> -> vector<16x128xf32>
    %c0_3 = arith.constant 0 : index
    %c0_4 = arith.constant 0 : index
    %3 = vector.load %arg3[%c0_3, %c0_4] : memref<1x128xf32, #tpu.memory_space<vmem>>, vector<1x128xf32>
    %4 = vector.broadcast %3 : vector<1x128xf32> to vector<16x128xf32>
    %5 = arith.addf %2, %4 : vector<16x128xf32>
    %c0_5 = arith.constant 0 : index
    %c0_6 = arith.constant 0 : index
    %6 = vector.load %arg4[%c0_5, %c0_6] : memref<16x128xf32, #tpu.memory_space<vmem>>, vector<16x128xf32>
    tpu.vector_store %arg4[%c0_5, %c0_6], %5 {strides = array<i32>} : memref<16x128xf32, #tpu.memory_space<vmem>>, vector<16x128xf32>,
    return
  }
  func.func @transform_0(%arg0: i32) -> (i32, i32) {
    %c0_i32 = arith.constant 0 : i32
    %c0_i32_0 = arith.constant 0 : i32
    return %arg0, %c0_i32 : i32, i32
  }
  func.func @transform_1(%arg0: i32) -> (i32, i32) {
    %c0_i32 = arith.constant 0 : i32
    %c0_i32_0 = arith.constant 0 : i32
    %c0_i32_1 = arith.constant 0 : i32
    return %c0_i32, %c0_i32_0 : i32, i32
  }
  func.func @transform_2(%arg0: i32) -> (i32, i32) {
    %c0_i32 = arith.constant 0 : i32
    %c0_i32_0 = arith.constant 0 : i32
    %c0_i32_1 = arith.constant 0 : i32
    return %c0_i32, %c0_i32_0 : i32, i32
  }
  func.func @transform_3(%arg0: i32) -> (i32, i32) {
    %c0_i32 = arith.constant 0 : i32
    %c0_i32_0 = arith.constant 0 : i32
    return %arg0, %c0_i32 : i32, i32
  }
}

</mosaic_0001>

<bundles_post_ra>
// kernel: tpu_custom_call.1
= control target key start
LH: loop header
LB: loop body
LE: loop exit
PB: predicated region body
PF: predicated region fallthrough
CT: control target
= control target key end

     0   :  { %8 = vsyncpa [#allocation3], 0  ;;  %s838_s0 = inlined_call_operand.hbm [shape: f32[32,32], index: 0, kind: input, shape index: {}]   ;;  %s839_s1 = inlined_call_operand.hbm [shape: f32[32,128], index: 1, kind: input, shape index: {}]   ;;  %s840_s2 = inlined_call_operand.vmem [shape: f32[1,128], index: 2, kind: input, shape index: {}]   ;;  %s841_s3 = inlined_call_operand.hbm [shape: f32[32,128], index: 3, kind: output, shape index: {}]  }
   0x1   :  { %10 = vsyncpa [#allocation3 + $0x1], 0 }
   0x2   :  { %11 = vsyncpa [#allocation6], 0 }
   0x3   :  { %12 = vsyncpa [#allocation4], 0 }
   0x4   :  { %14 = vsyncpa [#allocation4 + $0x1], 0  ;;  %s650_s12 = smov 0   ;;  %s652_s13 = smov 0  }
   0x5   :  { %s654_s14 = smov 0   ;;  %s656_s15 = smov 0  }
   0x6 LB: > { %s671_s16 = sadd.s32 4294967295, %s621_s15   ;;  %s400_s17 = sadd.s32 4294967294, %s621_s15   ;;  %s621_s15 = sphi %s656_s15, %s863_s15   ;;  %s617_s14 = sphi %s654_s14, %s862_s14   ;;  %s613_s13 = sphi %s652_s13, %s861_s13   ;;  %s609_s12 = sphi %s650_s12, %s860_s12  }
   0x7   : > { %p40_p0 = scmp.ne.s32.totalorder %s613_s13, %s609_s12  ;;  %p842_p1 = scmp.eq.s32.totalorder %s671_s16, 0 }
   0x8   : > { %p112_p3 = scmp.eq.s32.totalorder %s400_s17, 1  ;;  %p401_p5 = scmp.ge.s32.totalorder %s621_s15, 1 }
   0x9   : > { %p680_p4 = por %p842_p1, %p40_p0  ;;  %p119_p7 = scmp.lt.s32.totalorder %s621_s15, 3 }
   0xa   : > { %p685_p6 = por %p112_p3, %p40_p0  ;;  %s623_s21 = smov [#allocation5]  }
   0xb   : > { %s846_s18 = scalar_select %p680_p4, 1, 0 }
   0xc   : > { %s847_s19 = scalar_select %p685_p6, 1, 0 }
   0xd   : > { %p690_p8 = pnand %p401_p5, %p119_p7  ;;  %s131_s22 = sshll.u32 %s623_s21, 4  ;;  %s132_s22 = int_to_ptr.vmem [resolvable:$true] %s131_s22 }
   0xe   : > { %s704_s24 = sadd.s32 1, %s621_s15   ;;  %s27_s25 = sadd.s32 1, %s617_s14 }
   0xf   : > { %s848_s20 = scalar_select %p690_p8, 1, 0 }
  0x10   : > { %p446_p9 = pneg %p690_p8  ;;  %s24_s26 = ssub.s32 %s621_s15, %s704_s24 }
  0x11   : > { %s510_s27 = scalar_lea.vmem %s132_s22, 512  ;;  %p518_p5 = scmp.lt.s32.totalorder %s132_s22, %s132_s22 }
  0x12   : > { %p699_p11 = pnand %p446_p9, %p842_p1  ;;  %p511_p13 = scmp.ne.s32.totalorder %s132_s22, %s510_s27 }
  0x13   : > { %p519_p7 = scmp.lt.s32.totalorder %s510_s27, %s510_s27 }
  0x14   : > { %p501_p12 = pneg %p699_p11 }
  0x15   : > { %p520_p10 = por %p519_p7, %p518_p5 }
  0x16   : > { %p513_p0 = pnand %p511_p13, %p501_p12 }
  0x18   : > { %p514_p3 = pneg %p513_p0 }
  0x1a   : > { %p521_p2 = pnand %p520_p10, %p514_p3 }
  0x1c   : > { %524 = shalt.err (!%p521_p2)
}
  0x1d   : > { %s624_s28 = smov 128   ;;  %s625_s29 = smov 8  }
  0x1e   : > { %449 = dma.hbm_to_vmem [thread:$0]  (!%p699_p11), %s839_s1, 512, %s132_s22, [#allocation6], %s624_s28, %s624_s28, %s625_s29  }
  0x1f   : > { %p25_p2 = scmp.eq.s32.totalorder %s24_s26, 0  ;;  %p34_p9 = scmp.ne.s32.totalorder %s617_s14, %s613_s13 }
  0x20   : > { %p35_p10 = scmp.eq.s32.totalorder %s621_s15, 0  ;;  %p459_p12 = scmp.lt.s32.totalorder %s621_s15, 2 }
  0x21   : > { %s724_s5 = scalar_select %p25_p2, %s617_s14, %s27_s25  }
  0x22   : > { %p36_p13 = por %p35_p10, %p34_p9  ;;  %p850_p0 = scmp.eq.s32.totalorder %s671_s16, 1 }
  0x23   : > { %s148_s7 = sand.u32 1, %s617_s14   ;;  %s419_s8 = sshll.u32 %s621_s15, 8 }
  0x24   : > { %p728_p3 = por %p850_p0, %p34_p9  ;;  %s404_s9 = sshll.u32 %s148_s7, 4 }
  0x25   : > { %s737_s17 = scalar_lea.hbm %s838_s0, %s419_s8  ;;  %s152_s21 = scalar_lea.vmem [#allocation2], %s404_s9 }
  0x26   : > { %s851_s6 = scalar_select %p728_p3, 1, 0 }
  0x27   : > { %s159_s22 = sshll.u32 %s152_s21, 4  ;;  %p739_p11 = pnand %p459_p12, %p36_p13  ;;  %s743_s22 = int_to_ptr.vmem [resolvable:$true] %s159_s22 }
  0x28   : > { %s745_s25 = scalar_lea.sflag [#allocation3], %s148_s7  ;;  %s525_s26 = scalar_lea.hbm %s737_s17, 256 }
  0x29   : > { %p526_p5 = scmp.ne.s32.totalorder %s737_s17, %s525_s26  ;;  %p527_p7 = pneg %p739_p11 }
  0x2a   : > { %s530_s4 = scalar_lea.hbm %s838_s0, 512  ;;  %p531_p10 = scmp.lt.s32.totalorder %s737_s17, %s838_s0 }
  0x2b   : > { %p528_p2 = pnand %p527_p7, %p526_p5  ;;  %p532_p12 = scmp.lt.s32.totalorder %s530_s4, %s525_s26 }
  0x2d   : > { %p529_p9 = pneg %p528_p2  ;;  %p533_p13 = por %p532_p12, %p531_p10 }
  0x2f   : > { %p534_p0 = pnand %p533_p13, %p529_p9 }
  0x31   : > { %537 = shalt.err (!%p534_p0)
}
  0x32   : > { %s538_s7 = scalar_lea.vmem %s743_s22, 256  ;;  %s626_s10 = smov [#allocation2]  }
  0x33   : > { %p539_p1 = scmp.ne.s32.totalorder %s743_s22, %s538_s7  ;;  %s543_s11 = sshll.u32 %s626_s10, 4  ;;  %s544_s11 = int_to_ptr.vmem [resolvable:$false] %s543_s11 }
  0x34   : > { %s545_s21 = scalar_lea.vmem %s544_s11, 512  ;;  %p546_p2 = scmp.lt.s32.totalorder %s743_s22, %s544_s11 }
  0x35   : > { %p541_p6 = pnand %p539_p1, %p527_p7  ;;  %p547_p3 = scmp.lt.s32.totalorder %s545_s21, %s538_s7 }
  0x37   : > { %p542_p5 = pneg %p541_p6  ;;  %p548_p4 = por %p547_p3, %p546_p2 }
  0x39   : > { %p549_p8 = pnand %p548_p4, %p542_p5 }
  0x3b   : > { %552 = shalt.err (!%p549_p8)
}
  0x3c   : > { %453 = dma.hbm_to_vmem [thread:$0]  (!%p739_p11), %s737_s17, 256, %s743_s22, %s745_s25, %s624_s28, %s624_s28, %s625_s29  }
  0x3d   : > { %p853_p1 = scmp.ne.s32.totalorder %s848_s20, 0 }
  0x3e   : > { %s772_s26 = sand.u32 (!%p853_p1), 1, %s613_s13   ;;  %p854_p4 = scmp.ne.s32.totalorder (!%p853_p1), %s846_s18, 0 }
  0x3f   : > { %171 = sbr.rel (%p853_p1) target bundleno = 292 (0x124), region = 32  ;;  %s408_s27 = sshll.u32 (!%p853_p1), %s772_s26, 4 }
  0x40   : > { %s174_s30 = scalar_lea.sflag (!%p853_p1), [#allocation3], %s772_s26  ;;  %s177_s4 = scalar_lea.vmem (!%p853_p1), [#allocation2], %s408_s27 }
  0x44   : > { %596 = dma.done.wait (%p854_p4), %s174_s30, 256  }
  0x45   : > { %598 = vsyncadd (%p854_p4), %s174_s30, 4294967040  ;;  %p855_p6 = scmp.eq.s32.totalorder %s671_s16, 0 }
  0x47   : > { %600 = dma.done.wait (%p855_p6), [#allocation6], 512   ;;  %p856_p8 = pmov %p855_p6 }
  0x48   : > { %vm219_vm0 = vcmask 261120   ;;  %v211_v0 = vld [vmem:[#allocation5 + $0x18] sm:$0xff]  ;;  %v210_v1 = vld [vmem:[#allocation5 + $0x10] sm:$0xff]  ;;  %v209_v3 = vld [vmem:[#allocation5 + $0x8] sm:$0xff]  ;;  %s203_s28 = scalar_lea.vmem [#allocation7], %s408_s27  ;;  %s420_s17 = sshll.u32 %s671_s16, 8 }
  0x49   : > { %602 = vsyncadd (%p856_p8), [#allocation6], 4294966784  ;;  %427 = vmatprep.subr.mxu0 %v211_v0  ;;  %v206_v2 = vld [vmem:[%s177_s4] sm:$0xff]  ;;  %v207_v5 = vld [vmem:[%s177_s4 + $0x8] sm:$0xff]  ;;  %s317_s29 = sshll.u32 %s203_s28, 4  ;;  %s795_s25 = scalar_lea.hbm %s841_s3, %s420_s17  ;;  %s790_s29 = int_to_ptr.vmem [resolvable:$true] %s317_s29 }
  0x4a   : > { %428 = vmatpush3.msra.mxu0 %v211_v0  ;;  %435 = vmatprep.mubr.msk.f32.mxu0 %vm219_vm0, %v206_v2  ;;  %v208_v4 = vld [vmem:[#allocation5] sm:$0xff]  ;;  %s304_s8 = scalar_lea.sflag [#allocation4], %s772_s26  ;;  %s553_s9 = scalar_lea.vmem %s790_s29, 256 }
  0x4b   : > { %429 = vmatprep.subr.mxu0 %v210_v1  ;;  %v411_v6 = vld [vmem:[%s840_s2] ss:$0 sm:$0xff]  ;;  %p554_p3 = scmp.ne.s32.totalorder %s790_s29, %s553_s9  ;;  %p857_p11 = scmp.ne.s32.totalorder %s851_s6, 0 }
  0x4c   : > { %430 = vmatpush3.msra.mxu0 %v210_v1  ;;  %s627_s16 = smov [#allocation7]  }
  0x4d   : > { %431 = vmatprep.subr.mxu0 %v209_v3  ;;  %p555_p7 = pnand %p554_p3, %p857_p11  ;;  %s557_s7 = sshll.u32 %s627_s16, 4  ;;  %s558_s7 = int_to_ptr.vmem [resolvable:$false] %s557_s7 }
  0x4e   : > { %432 = vmatpush3.msra.mxu0 %v209_v3  ;;  %s559_s10 = scalar_lea.vmem %s558_s7, 512  ;;  %p560_p10 = scmp.lt.s32.totalorder %s790_s29, %s558_s7 }
  0x4f   : > { %433 = vmatprep.subr.mxu0 %v208_v4  ;;  %p556_p9 = pneg %p555_p7  ;;  %p561_p12 = scmp.lt.s32.totalorder %s559_s10, %s553_s9 }
  0x50   : > { %434 = vmatpush3.msra.mxu0 %v208_v4 }
  0x51   : > { %436 = vmatmul.mubr.msk.f32.vlgmr.msra.gmra.mxu0 %vm219_vm0, %v207_v5  ;;  %p562_p13 = por %p561_p12, %p560_p10 }
  0x53   : > { %p563_p0 = pnand %p562_p13, %p556_p9 }
 0x111   : > { %v437_v7 = vpop.f32.mrf.mxu0 }
 0x112   : > { %v298_v8 = vadd.f32 %v437_v7, %v411_v6 }
 0x113   : > { %v292_v9 = vpop.f32.mrf.mxu0 }
 0x114   : > { %302 = vst [vmem:[%s203_s28 + $0x8] sm:$0xff] %v298_v8  ;;  %v293_v10 = vadd.f32 %v411_v6, %v292_v9 }
 0x116   : > { %301 = vst [vmem:[%s203_s28] sm:$0xff] %v293_v10 }
 0x117   : > { %566 = shalt.err (!%p563_p0)
}
 0x118   : > { %s567_s11 = scalar_lea.hbm %s795_s25, 256  ;;  %s571_s30 = scalar_lea.hbm %s841_s3, 512 }
 0x119   : > { %p568_p5 = scmp.ne.s32.totalorder %s795_s25, %s567_s11  ;;  %p572_p4 = scmp.lt.s32.totalorder %s795_s25, %s841_s3 }
 0x11a   : > { %p573_p6 = scmp.lt.s32.totalorder %s571_s30, %s567_s11 }
 0x11b   : > { %p569_p2 = pnand %p568_p5, %p857_p11 }
 0x11c   : > { %p574_p8 = por %p573_p6, %p572_p4 }
 0x11d   : > { %p570_p1 = pneg %p569_p2 }
 0x11f   : > { %p575_p3 = pnand %p574_p8, %p570_p1 }
 0x121   : > { %578 = shalt.err (!%p575_p3)
}
 0x122   : > { %s628_s20 = smov 128   ;;  %s629_s28 = smov 8  }
 0x123   : > { %444 = dma.vmem_to_hbm [thread:$0]  (%p857_p11), %s790_s29, 256, %s795_s25, %s304_s8, %s628_s20, %s628_s20, %s629_s28  }
 0x124 PF: > { %s332_s17 = sand.u32 1, %s609_s12   ;;  %p858_p7 = scmp.ne.s32.totalorder %s847_s19, 0 }
 0x125   : > { %p859_p9 = scmp.ge.s32.totalorder %s621_s15, 2  ;;  %s333_s22 = scalar_lea.sflag [#allocation4], %s332_s17 }
 0x127   : > { %p455_p10 = pnand %p859_p9, %p858_p7 }
 0x129   : > { %p456_p12 = pneg %p455_p10 }
 0x12b   : > { %604 = dma.done.wait (%p456_p12), %s333_s22, 256  }
 0x12c   : > { %606 = vsyncadd (%p456_p12), %s333_s22, 4294967040  ;;  %p17_p13 = scmp.ge.s32.totalorder %s704_s24, 4   ;;  %s860_s12 = smov %s613_s13 }
 0x12d   : > { %s861_s13 = smov %s617_s14  ;;  %s862_s14 = smov %s724_s5 }
 0x12e   : > { %s863_s15 = smov %s704_s24  ;;  %19 = sbr.rel (!%p17_p13) target bundleno = 6 (0x6), region = 81 }
 0x133   :  { %338 = vsyncpa [#allocation3], 1 }
 0x134   :  { %340 = vsyncpa [#allocation3 + $0x1], 1 }
 0x135   :  { %341 = vsyncpa [#allocation6], 1 }
 0x136   :  { %342 = vsyncpa [#allocation4], 1 }
 0x137   :  { %344 = vsyncpa [#allocation4 + $0x1], 1 }

</bundles_post_ra>
